<compile_context>
chip_gen: v5e
topology: v5e:2x2
jax: 0.10.0
libtpu: 0.0.40
codegen_flags: <defaults>
</compile_context>

<pallas_src>
import functools

import jax
import jax.numpy as jnp
from jax import lax
from jax.experimental import pallas as pl
from jax.experimental.pallas import tpu as pltpu

SEP_TOKEN_IDX = 3   # stand-in for BytePairEncoding.SEP_token_idx


def _seg_emb_kernel(x_ref, tok_ref, emb_ref, o_ref, *, sep_idx, max_seg_id):
    """One batch tile.

    x_ref   : (BT, S, H) f32   input activations
    tok_ref : (BT, S)    i32   token ids
    emb_ref : (G,  H)    f32   segmentation embedding table (G = max_seg_id)
    o_ref   : (BT, S, H) f32   output
    """
    tok = tok_ref[...]                                        # (BT, S) i32
    is_sep = (tok == sep_idx).astype(jnp.float32)             # (BT, S)

    # Strictly-upper-triangular ones built in-kernel: U[j, i] = 1.0 iff j < i.
    s = tok.shape[-1]
    row = lax.broadcasted_iota(jnp.int32, (s, s), 0)
    col = lax.broadcasted_iota(jnp.int32, (s, s), 1)
    upper_strict = (row < col).astype(jnp.float32)            # (S, S)

    # Exclusive prefix count of SEP tokens along the sequence axis:
    #   seg[b, i] = sum_{j < i} is_sep[b, j]
    # == cumsum(is_sep, dim=0) - is_sep of the PyTorch reference.  Single MXU matmul.
    seg = jnp.dot(is_sep, upper_strict,
                  preferred_element_type=jnp.float32)         # (BT, S), exact small ints
    seg_ids = seg.astype(jnp.int32)                           # (BT, S)

    out = x_ref[...]                                          # (BT, S, H) f32
    # Embedding lookup: the table has only `max_seg_id` rows, so an unrolled
    # one-hot select (VPU) fused with the residual add beats any real gather.
    # NOTE: seg_ids >= max_seg_id (more SEPs than table rows) would be an index
    # error in PyTorch; here such rows simply get no embedding added.
    for k in range(max_seg_id):
        sel_k = (seg_ids == k).astype(jnp.float32)[:, :, None]    # (BT, S, 1)
        emb_k = emb_ref[k:k + 1, :].reshape(1, 1, -1)             # (1, 1, H)
        out = out + sel_k * emb_k
    o_ref[...] = out.astype(o_ref.dtype)


def segmentation_embeddings(x, tokens, emb_table, sep_idx=SEP_TOKEN_IDX):
    """x: (S, B, H) float; tokens: (S, B) int; emb_table: (max_seg_id, H) float.
    Returns (S, B, H) float32, matching SegmentationEmbeddings.forward."""
    S, B, H = x.shape
    G = emb_table.shape[0]

    # ---- glue: batch-major layout so the hidden dim is lane-dense in the kernel ----
    x_b = jnp.transpose(x, (1, 0, 2)).astype(jnp.float32)        # (B, S, H)
    tok_b = jnp.transpose(tokens, (1, 0)).astype(jnp.int32)      # (B, S)
    emb = emb_table.astype(jnp.float32)                          # (G, H)

    # Whole batch in one grid step at these sizes (fits VMEM easily); for large B the
    # grid tiles the batch axis only, and "parallel" shards tiles across v7x's 2 TCs.
    BT = B if B <= 256 else 256
    grid = (pl.cdiv(B, BT),)

    kernel = functools.partial(_seg_emb_kernel, sep_idx=int(sep_idx), max_seg_id=G)

    out_b = pl.pallas_call(
        kernel,
        out_shape=jax.ShapeDtypeStruct((B, S, H), jnp.float32),
        grid_spec=pltpu.PrefetchScalarGridSpec(
            num_scalar_prefetch=0,
            grid=grid,
            in_specs=[
                pl.BlockSpec((BT, S, H), lambda i: (i, 0, 0)),   # x (batch tile)
                pl.BlockSpec((BT, S), lambda i: (i, 0)),         # tokens (batch tile)
                pl.BlockSpec((G, H), lambda i: (0, 0)),          # embedding table
            ],
            out_specs=pl.BlockSpec((BT, S, H), lambda i: (i, 0, 0)),
        ),
        compiler_params=pltpu.CompilerParams(
            dimension_semantics=("parallel",)),
    )(x_b, tok_b, emb)

    return jnp.transpose(out_b, (1, 0, 2))                       # back to (S, B, H)


def reference_segmentation_embeddings(x, tokens, emb_table, sep_idx=SEP_TOKEN_IDX):
    """Pure-JAX transcription of the PyTorch forward (for verification)."""
    is_sep = (tokens == sep_idx).astype(jnp.int32)               # (S, B)
    seg_ids = jnp.cumsum(is_sep, axis=0) - is_sep                # (S, B) exclusive count
    return x + emb_table[seg_ids]                                # (S, B, H)


if __name__ == "__main__":
    S, B, H, MAX_SEG = 8, 2, 32, 3

    root = jax.random.PRNGKey(0)
    k_x, k_tok, k_emb = jax.random.split(root, 3)

    # tokens: random non-SEP ids, with SEP placed at fixed positions so seg_ids
    # stays within [0, MAX_SEG) as the PyTorch nn.Embedding requires.
    tokens = jax.random.randint(k_tok, (S, B), 4, 20, dtype=jnp.int32)
    tokens = tokens.at[2, 0].set(SEP_TOKEN_IDX)
    tokens = tokens.at[5, 0].set(SEP_TOKEN_IDX)
    tokens = tokens.at[3, 1].set(SEP_TOKEN_IDX)

    x = jax.random.normal(k_x, (S, B, H), jnp.float32)
    emb_table = jax.random.normal(k_emb, (MAX_SEG, H), jnp.float32) * 0.1

    out = segmentation_embeddings(x, tokens, emb_table, SEP_TOKEN_IDX)
    out = jax.block_until_ready(out)

    ref = reference_segmentation_embeddings(x, tokens, emb_table, SEP_TOKEN_IDX)
    assert out.shape == (S, B, H)
    assert jnp.allclose(out, ref, atol=1e-5, rtol=1e-5), "Pallas kernel mismatch vs reference"

    print("KERNEL_OK")
</pallas_src>

<mosaic_0001>
module attributes {stable_mosaic.version = 11 : i64} {
  func.func @_seg_emb_kernel(%arg0: i32, %arg1: memref<2x8x32xf32, #tpu.memory_space<vmem>>, %arg2: memref<2x8xi32, #tpu.memory_space<vmem>>, %arg3: memref<3x32xf32, #tpu.memory_space<vmem>>, %arg4: memref<2x8x32xf32, #tpu.memory_space<vmem>>) attributes {dimension_semantics = [#tpu.dimension_semantics<parallel>], iteration_bounds = array<i64: 1>, scalar_prefetch = 0 : i64, scratch_operands = 0 : i64, tpu.core_type = #tpu.core_type<tc>, window_params = [{transform_indices = @transform_0, window_bounds = array<i64: 2, 8, 32>}, {transform_indices = @transform_1, window_bounds = array<i64: 2, 8>}, {pipeline_mode = #tpu.pipeline_mode<synchronous>, transform_indices = @transform_2, window_bounds = array<i64: 3, 32>}, {transform_indices = @transform_3, window_bounds = array<i64: 2, 8, 32>}]} {
    %c0 = arith.constant 0 : index
    %c0_0 = arith.constant 0 : index
    %0 = vector.load %arg2[%c0, %c0_0] : memref<2x8xi32, #tpu.memory_space<vmem>>, vector<2x8xi32>
    %c3_i32 = arith.constant 3 : i32
    %1 = vector.broadcast %c3_i32 : i32 to vector<2x8xi32>
    %2 = arith.cmpi eq, %0, %1 : vector<2x8xi32>
    %3 = arith.extui %2 : vector<2x8xi1> to vector<2x8xi32>
    %4 = arith.sitofp %3 : vector<2x8xi32> to vector<2x8xf32>
    %5 = tpu.iota {dimensions = array<i32: 0>} : vector<8x8xi32>
    %6 = tpu.iota {dimensions = array<i32: 1>} : vector<8x8xi32>
    %7 = arith.cmpi slt, %5, %6 : vector<8x8xi32>
    %8 = arith.extui %7 : vector<8x8xi1> to vector<8x8xi32>
    %9 = arith.sitofp %8 : vector<8x8xi32> to vector<8x8xf32>
    %cst = arith.constant dense<0.000000e+00> : vector<2x8xf32>
    %10 = tpu.matmul %4, %9, %cst {dimension_numbers = #tpu.dot_dimension_numbers<[1], [0], [0], [1], [0, 0, 1, 1], [], []>} : vector<2x8xf32>, vector<8x8xf32>, vector<2x8xf32> -> vector<2x8xf32>
    %11 = arith.fptosi %10 : vector<2x8xf32> to vector<2x8xi32>
    %c0_1 = arith.constant 0 : index
    %c0_2 = arith.constant 0 : index
    %c0_3 = arith.constant 0 : index
    %12 = vector.load %arg1[%c0_1, %c0_2, %c0_3] : memref<2x8x32xf32, #tpu.memory_space<vmem>>, vector<2x8x32xf32>
    %c0_i32 = arith.constant 0 : i32
    %13 = vector.broadcast %c0_i32 : i32 to vector<2x8xi32>
    %14 = arith.cmpi eq, %11, %13 : vector<2x8xi32>
    %15 = arith.extui %14 : vector<2x8xi1> to vector<2x8xi32>
    %16 = arith.sitofp %15 : vector<2x8xi32> to vector<2x8xf32>
    %17 = vector.shape_cast %16 : vector<2x8xf32> to vector<2x8x1xf32>
    %c0_4 = arith.constant 0 : index
    %c0_5 = arith.constant 0 : index
    %18 = vector.load %arg3[%c0_4, %c0_5] : memref<3x32xf32, #tpu.memory_space<vmem>>, vector<1x32xf32>
    %19 = vector.shape_cast %18 : vector<1x32xf32> to vector<1x1x32xf32>
    %20 = vector.broadcast %17 : vector<2x8x1xf32> to vector<2x8x32xf32>
    %21 = vector.broadcast %19 : vector<1x1x32xf32> to vector<2x8x32xf32>
    %22 = arith.mulf %20, %21 : vector<2x8x32xf32>
    %23 = arith.addf %12, %22 : vector<2x8x32xf32>
    %c1_i32 = arith.constant 1 : i32
    %24 = vector.broadcast %c1_i32 : i32 to vector<2x8xi32>
    %25 = arith.cmpi eq, %11, %24 : vector<2x8xi32>
    %26 = arith.extui %25 : vector<2x8xi1> to vector<2x8xi32>
    %27 = arith.sitofp %26 : vector<2x8xi32> to vector<2x8xf32>
    %28 = vector.shape_cast %27 : vector<2x8xf32> to vector<2x8x1xf32>
    %c1 = arith.constant 1 : index
    %c0_6 = arith.constant 0 : index
    %29 = vector.load %arg3[%c1, %c0_6] : memref<3x32xf32, #tpu.memory_space<vmem>>, vector<1x32xf32>
    %30 = vector.shape_cast %29 : vector<1x32xf32> to vector<1x1x32xf32>
    %31 = vector.broadcast %28 : vector<2x8x1xf32> to vector<2x8x32xf32>
    %32 = vector.broadcast %30 : vector<1x1x32xf32> to vector<2x8x32xf32>
    %33 = arith.mulf %31, %32 : vector<2x8x32xf32>
    %34 = arith.addf %23, %33 : vector<2x8x32xf32>
    %c2_i32 = arith.constant 2 : i32
    %35 = vector.broadcast %c2_i32 : i32 to vector<2x8xi32>
    %36 = arith.cmpi eq, %11, %35 : vector<2x8xi32>
    %37 = arith.extui %36 : vector<2x8xi1> to vector<2x8xi32>
    %38 = arith.sitofp %37 : vector<2x8xi32> to vector<2x8xf32>
    %39 = vector.shape_cast %38 : vector<2x8xf32> to vector<2x8x1xf32>
    %c2 = arith.constant 2 : index
    %c0_7 = arith.constant 0 : index
    %40 = vector.load %arg3[%c2, %c0_7] : memref<3x32xf32, #tpu.memory_space<vmem>>, vector<1x32xf32>
    %41 = vector.shape_cast %40 : vector<1x32xf32> to vector<1x1x32xf32>
    %42 = vector.broadcast %39 : vector<2x8x1xf32> to vector<2x8x32xf32>
    %43 = vector.broadcast %41 : vector<1x1x32xf32> to vector<2x8x32xf32>
    %44 = arith.mulf %42, %43 : vector<2x8x32xf32>
    %45 = arith.addf %34, %44 : vector<2x8x32xf32>
    %c0_8 = arith.constant 0 : index
    %c0_9 = arith.constant 0 : index
    %c0_10 = arith.constant 0 : index
    %46 = vector.load %arg4[%c0_8, %c0_9, %c0_10] : memref<2x8x32xf32, #tpu.memory_space<vmem>>, vector<2x8x32xf32>
    tpu.vector_store %arg4[%c0_8, %c0_9, %c0_10], %45 {strides = array<i32>} : memref<2x8x32xf32, #tpu.memory_space<vmem>>, vector<2x8x32xf32>,
    return
  }
  func.func @transform_0(%arg0: i32) -> (i32, i32, i32) {
    %c0_i32 = arith.constant 0 : i32
    %c0_i32_0 = arith.constant 0 : i32
    %c0_i32_1 = arith.constant 0 : i32
    return %arg0, %c0_i32, %c0_i32_0 : i32, i32, i32
  }
  func.func @transform_1(%arg0: i32) -> (i32, i32) {
    %c0_i32 = arith.constant 0 : i32
    %c0_i32_0 = arith.constant 0 : i32
    return %arg0, %c0_i32 : i32, i32
  }
  func.func @transform_2(%arg0: i32) -> (i32, i32) {
    %c0_i32 = arith.constant 0 : i32
    %c0_i32_0 = arith.constant 0 : i32
    %c0_i32_1 = arith.constant 0 : i32
    return %c0_i32, %c0_i32_0 : i32, i32
  }
  func.func @transform_3(%arg0: i32) -> (i32, i32, i32) {
    %c0_i32 = arith.constant 0 : i32
    %c0_i32_0 = arith.constant 0 : i32
    %c0_i32_1 = arith.constant 0 : i32
    return %arg0, %c0_i32, %c0_i32_0 : i32, i32, i32
  }
}

</mosaic_0001>

<bundles_post_ra>
// kernel: tpu_custom_call.1
= control target key start
LH: loop header
LB: loop body
LE: loop exit
PB: predicated region body
PF: predicated region fallthrough
CT: control target
= control target key end

     0   :  { %8 = vsyncpa [#allocation3], 0  ;;  %s376_s0 = inlined_call_operand.hbm [shape: f32[2,8,32], index: 0, kind: input, shape index: {}]   ;;  %s377_s1 = inlined_call_operand.hbm [shape: s32[2,8], index: 1, kind: input, shape index: {}]   ;;  %s378_s2 = inlined_call_operand.hbm [shape: f32[3,32], index: 2, kind: input, shape index: {}]   ;;  %s379_s3 = inlined_call_operand.hbm [shape: f32[2,8,32], index: 3, kind: output, shape index: {}]  }
   0x1   :  { %9 = vsyncpa [#allocation6], 0  ;;  %s29_s14 = sshll.u32 %s377_s1, 4  ;;  %s30_s14 = int_to_ptr.hbm [resolvable:$true] %s29_s14 }
   0x2   :  { %10 = vsyncpa [#allocation4], 0  ;;  %s330_s15 = smov [#allocation5]   ;;  %s15_s19 = sshll.u32 %s376_s0, 4  ;;  %s16_s19 = int_to_ptr.hbm [resolvable:$true] %s15_s19 }
   0x3   :  { %s31_s16 = sshll.u32 %s330_s15, 4  ;;  %s331_s20 = smov [#allocation2]   ;;  %s32_s16 = int_to_ptr.vmem [resolvable:$true] %s31_s16 }
   0x4   :  { %34 = dma.hbm_to_vmem [thread:$0]  %s30_s14, 32, %s32_s16, [#allocation6]  }
   0x5   :  { %s17_s21 = sshll.u32 %s331_s20, 4  ;;  %s332_s22 = smov 128   ;;  %s18_s21 = int_to_ptr.vmem [resolvable:$true] %s17_s21 }
   0x6   :  { %s333_s23 = smov 8   ;;  %s40_s25 = sshll.u32 %s378_s2, 4  ;;  %s41_s25 = int_to_ptr.hbm [resolvable:$true] %s40_s25 }
   0x7   :  { %23 = dma.hbm_to_vmem [thread:$0]  %s16_s19, 256, %s18_s21, [#allocation3], %s332_s22, %s332_s22, %s333_s23  }
   0x8   :  { %s334_s26 = smov [#allocation7]  }
   0x9   :  { %s42_s27 = sshll.u32 %s334_s26, 4  ;;  %s43_s27 = int_to_ptr.vmem [resolvable:$true] %s42_s27 }
   0xa   :  { %45 = dma.hbm_to_vmem [thread:$0]  %s41_s25, 64, %s43_s27, [#allocation6]  }
   0xb   :  { %324 = dma.done.wait [#allocation3], 256  }
   0xc   :  { %325 = vsyncadd [#allocation3], 4294967040 }
   0xd   :  { %326 = dma.done.wait [#allocation6], 96  }
   0xe   :  { %327 = vsyncadd [#allocation6], 4294967200  ;;  %v62_v0 = vlaneseq  ;;  %v335_v3 = vmov 1.0   ;;  %vm69_vm1 = vcmask 64512   ;;  %v58_v4 = vld [vmem:[#allocation5] sm:$0x3] }
   0xf   :  { %vm59_vm2 = vcmp.eq.s32.totalorder %v58_v4, 3  ;;  %v336_v5 = vmov 0.0   ;;  %v226_v25 = vld [vmem:[#allocation7] ss:$0 sm:$0xff]  ;;  %v227_v31 = vld [vmem:[#allocation7 + $0x1] ss:$0 sm:$0xff] }
  0x10   :  { %v63_v1 = vshrl.u32 %v62_v0, 7  ;;  %v65_v2 = vand.u32 127, %v62_v0  ;;  %v188_v6 = vsel %vm59_vm2, 1.0, %v336_v5  ;;  %v94_v32 = vld [vmem:[#allocation2] sm:$0xff]  ;;  %v95_v33 = vld [vmem:[#allocation2 + $0x8] sm:$0xff]  ;;  %s337_s0 = smov [#allocation8]  }
  0x11   :  { %v225_v35 = vld [vmem:[#allocation7 + $0x2] ss:$0 sm:$0xff]  ;;  %s172_s2 = sshll.u32 %s337_s0, 4  ;;  %s174_s30 = sshll.u32 %s379_s3, 4  ;;  %vm165_vm7 = vcmask 261120   ;;  %s173_s2 = int_to_ptr.vmem [resolvable:$true] %s172_s2  ;;  %s175_s30 = int_to_ptr.hbm [resolvable:$true] %s174_s30 }
  0x12   :  { %vm66_vm0 = vcmp.lt.s32.totalorder %v63_v1, %v65_v2  ;;  %219 = vset.pattern.permute.xlu1 %v63_v1  ;;  %208 = vset.pattern.permute.xlu0 %v63_v1 }
  0x13   :  { %190 = vmatpush.msk.msra.mxu0 %vm66_vm0, %v335_v3 }
  0x14   :  { %191 = vmatmul.msk.f32.vlgmr.msra.gmra.mxu0 %vm69_vm1, %v188_v6 }
  0x91   :  { %v90_v7 = vpop.f32.mrf.mxu0 }
  0x92   :  { %vm195_vm3 = vcmp.lt.s32.totalorder %v90_v7, 0  ;;  %v196_v8 = vceil.f32 %v90_v7  ;;  %v197_v9 = vfloor.f32 %v90_v7 }
  0x94   :  { %v198_v10 = vsel %vm195_vm3, %v196_v8, %v197_v9 }
  0x95   :  { %v199_v11 = vcvt.f32.s32 %v198_v10 }
  0x97   :  { %vm142_vm4 = vcmp.eq.s32.totalorder %v199_v11, 2  ;;  %vm96_vm5 = vcmp.eq.s32.totalorder %v199_v11, 0  ;;  %vm119_vm6 = vcmp.eq.s32.totalorder %v199_v11, 1 }
  0x98   :  { %v194_v12 = vsel %vm142_vm4, 1.0, %v336_v5  ;;  %v192_v13 = vsel %vm96_vm5, 1.0, %v336_v5  ;;  %v193_v20 = vsel %vm119_vm6, 1.0, %v336_v5 }
  0x99   :  { %v145_v14 = vperm.slane %v194_v12, 0  ;;  %v152_v15 = vperm.slane %v194_v12, 1  ;;  %v99_v16 = vperm.slane %v192_v13, 0  ;;  %v106_v17 = vperm.slane %v192_v13, 1 }
  0x9a   :  { %v122_v21 = vperm.slane %v193_v20, 0  ;;  %v129_v22 = vperm.slane %v193_v20, 1 }
  0x9b   :  { %v220_v18 = vpack.i.bf16 %v152_v15, %v145_v14  ;;  %v209_v19 = vpack.i.bf16 %v106_v17, %v99_v16 }
  0x9c   :  { %v214_v23 = vpack.i.bf16 %v129_v22, %v122_v21 }
  0x9d   :  { %221 = vperm.xlu1 %219, %v220_v18   ;;  %210 = vperm.xlu0 %208, %v209_v19  }
  0xa5   :  { %215 = vperm.xlu0 %208, %v214_v23  }
 0x10f   :  { %v211_v24 = vpop.permute.xlu0 %210  ;;  %v222_v28 = vpop.permute.xlu1 %221 }
 0x110   :  { %v213_v26 = vunpack.i.h.bf16 %v211_v24  ;;  %v212_v27 = vunpack.i.l.bf16 %v211_v24  ;;  %v224_v36 = vunpack.i.h.bf16 %v222_v28  ;;  %v223_v37 = vunpack.i.l.bf16 %v222_v28 }
 0x112   :  { %v116_v29 = vmul.f32 %v226_v25, %v213_v26  ;;  %v115_v30 = vmul.f32 %v226_v25, %v212_v27  ;;  %v162_v44 = vmul.f32 %v225_v35, %v224_v36  ;;  %v161_v45 = vmul.f32 %v225_v35, %v223_v37 }
 0x114   :  { %v118_v40 = vadd.f32 %v116_v29, %v95_v33  ;;  %v117_v41 = vadd.f32 %v115_v30, %v94_v32 }
 0x117   :  { %v216_v34 = vpop.permute.xlu0 %215 }
 0x118   :  { %v218_v38 = vunpack.i.h.bf16 %v216_v34  ;;  %v217_v39 = vunpack.i.l.bf16 %v216_v34 }
 0x11a   :  { %v139_v42 = vmul.f32 %v227_v31, %v218_v38  ;;  %v138_v43 = vmul.f32 %v227_v31, %v217_v39 }
 0x11c   :  { %v140_v46 = vadd.f32 %v138_v43, %v117_v41  ;;  %v141_v47 = vadd.f32 %v139_v42, %v118_v40 }
 0x11e   :  { %v163_v48 = vadd.f32 %v161_v45, %v140_v46  ;;  %v164_v49 = vadd.f32 %v162_v44, %v141_v47 }
 0x120   :  { %166 = vst.msk [vmem:[#allocation8] sm:$0xff] %vm165_vm7, %v163_v48 }
 0x121   :  { %167 = vst.msk [vmem:[#allocation8 + $0x8] sm:$0xff] %vm165_vm7, %v164_v49 }
 0x122   :  { %180 = dma.vmem_to_hbm [thread:$0]  %s173_s2, 256, %s175_s30, [#allocation4], %s332_s22, %s332_s22, %s333_s23  }
 0x123   :  { %328 = dma.done.wait [#allocation4], 256  }
 0x124   :  { %329 = vsyncadd [#allocation4], 4294967040 }
 0x125   :  { %185 = vsyncpa [#allocation3], 1 }
 0x126   :  { %186 = vsyncpa [#allocation6], 1 }
 0x127   :  { %187 = vsyncpa [#allocation4], 1 }

</bundles_post_ra>
